<compile_context>
chip_gen: v7x
topology: tpu7x:2x2x1
jax: 0.10.0
libtpu: 0.0.40
codegen_flags: <defaults>
</compile_context>

<pallas_src>
import numpy as np

import jax
import jax.numpy as jnp
from jax import lax
from jax.experimental import pallas as pl
from jax.experimental.pallas import tpu as pltpu


def _resblock_kernel(x_ref, w1_ref, b1_ref, w2_ref, b2_ref, out_ref):
    # x_ref  : (N, H, W*C)        raw input, lane-dense rows
    # w1_ref : (3*W*C, W*C)       conv1 K-merged block-Toeplitz weights
    # b1_ref : (1, W*C)           conv1 bias tiled across W
    # w2_ref : (3*W*C, W*C)       conv2 K-merged block-Toeplitz weights
    # b2_ref : (1, W*C)           conv2 bias tiled across W
    # out_ref: (N, H, W*C)
    N, H, WC = out_ref.shape

    x = x_ref[...]                                   # (N, H, WC) f32
    zrow = jnp.zeros((1, WC), jnp.float32)

    def slab(a):
        """(N, H, WC) activations -> (N*H, 3*WC) K-merged conv input slab.

        Column block ky holds the rows shifted by (ky - 1) with zero rows at
        the image top/bottom (padding=1 along H).  Width padding and the
        channel contraction live inside the Toeplitz weight matrix.
        """
        per_image = []
        for n in range(N):                           # static, N is tiny
            ap = jnp.concatenate([zrow, a[n], zrow], axis=0)   # (H+2, WC)
            per_image.append(
                jnp.concatenate([ap[0:H], ap[1:H + 1], ap[2:H + 2]], axis=1))
        return jnp.concatenate(per_image, axis=0)    # (N*H, 3*WC)

    # ---- conv1(relu(x)): one MXU matmul, bias broadcast-add --------------
    x3 = slab(jnp.maximum(x, 0.0))
    r1 = jnp.dot(x3, w1_ref[...],
                 preferred_element_type=jnp.float32) + b1_ref[...]

    # ---- conv2(relu(r1)) --------------------------------------------------
    r1 = jnp.maximum(r1, 0.0).reshape(N, H, WC)
    x3b = slab(r1)
    r2 = jnp.dot(x3b, w2_ref[...],
                 preferred_element_type=jnp.float32) + b2_ref[...]

    # ---- residual add (raw x), lane-dense store ----------------------------
    out = x.reshape(N * H, WC) + r2
    out_ref[...] = out.reshape(N, H, WC).astype(out_ref.dtype)


def _conv_toeplitz_merged(w_hwio, W):
    """(3,3,Cin,Cout) HWIO -> (3*W*Cin, W*Cout) K-merged block-Toeplitz.

    M[ky*W*Cin + wi*Cin + ci, wo*Cout + co] = w[ky, wi-wo+1, ci, co] for
    wi-wo+1 in {0,1,2}, zero otherwise — reproducing padding=1 along width.
    Fully vectorized: one gather + mask + transpose (no per-element updates).
    """
    kh, kw, cin, cout = w_hwio.shape
    wi = np.arange(W)[:, None]
    wo = np.arange(W)[None, :]
    kx = wi - wo + 1                                  # (W, W) static
    valid = (kx >= 0) & (kx < kw)
    kx_c = np.clip(kx, 0, kw - 1)

    m = w_hwio[:, kx_c]                               # (kh, W, W, cin, cout)
    m = jnp.where(jnp.asarray(valid)[None, :, :, None, None], m, 0.0)
    m = m.transpose(0, 1, 3, 2, 4)                    # (kh, wi, cin, wo, cout)
    return m.reshape(kh * W * cin, W * cout)          # (3*W*C, W*C)


@jax.jit
def resblock_pallas(x_nhwc, w1, b1, w2, b2):
    """x_nhwc: (N, H, W, C) float32. w*: (3,3,C,C) HWIO. b*: (C,)."""
    N, H, W, C = x_nhwc.shape
    WC = W * C

    x_flat = x_nhwc.reshape(N, H, WC)
    m1 = _conv_toeplitz_merged(w1, W)                 # (3*WC, WC)
    m2 = _conv_toeplitz_merged(w2, W)
    b1_t = jnp.tile(b1, W).reshape(1, WC)
    b2_t = jnp.tile(b2, W).reshape(1, WC)

    flops = 2 * 2 * (N * H) * (3 * WC) * WC           # two matmuls
    bytes_accessed = 4 * (2 * N * H * WC + 2 * 3 * WC * WC + 2 * WC)
    cost = pl.CostEstimate(flops=flops, transcendentals=0,
                           bytes_accessed=bytes_accessed)

    out_flat = pl.pallas_call(
        _resblock_kernel,
        out_shape=jax.ShapeDtypeStruct((N, H, WC), x_nhwc.dtype),
        grid=(1,),                                     # single step; batch in M
        in_specs=[
            pl.BlockSpec((N, H, WC), lambda i: (0, 0, 0)),     # x (all images)
            pl.BlockSpec((3 * WC, WC), lambda i: (0, 0)),      # m1
            pl.BlockSpec((1, WC), lambda i: (0, 0)),           # b1
            pl.BlockSpec((3 * WC, WC), lambda i: (0, 0)),      # m2
            pl.BlockSpec((1, WC), lambda i: (0, 0)),           # b2
        ],
        out_specs=pl.BlockSpec((N, H, WC), lambda i: (0, 0, 0)),
        compiler_params=pltpu.CompilerParams(
            dimension_semantics=("arbitrary",)),
        cost_estimate=cost,
    )(x_flat, m1, b1_t, m2, b2_t)

    return out_flat.reshape(N, H, W, C)


def resblock_reference(x_nhwc, w1, b1, w2, b2):
    """Pure-JAX reference matching the PyTorch forward (NHWC / HWIO)."""
    dn = ("NHWC", "HWIO", "NHWC")

    def conv(v, w, b):
        y = lax.conv_general_dilated(v, w, window_strides=(1, 1),
                                     padding="SAME", dimension_numbers=dn)
        return y + b[None, None, None, :]

    r = conv(jax.nn.relu(x_nhwc), w1, b1)
    r = conv(jax.nn.relu(r), w2, b2)
    return x_nhwc + r


if __name__ == "__main__":
    # Small shapes consistent with ResBlock(indim=8): N=2, C=8, H=W=16.
    N, H, W, C = 2, 16, 16, 8

    key = jax.random.PRNGKey(0)
    kx, kw1, kb1, kw2, kb2 = jax.random.split(key, 5)

    x = jax.random.normal(kx, (N, H, W, C), dtype=jnp.float32)

    # Deterministic parameter init (kaiming-uniform-like bound for 3x3 conv).
    fan_in = C * 3 * 3
    bound = 1.0 / (fan_in ** 0.5)
    w1 = jax.random.uniform(kw1, (3, 3, C, C), jnp.float32, -bound, bound)
    b1 = jax.random.uniform(kb1, (C,), jnp.float32, -bound, bound)
    w2 = jax.random.uniform(kw2, (3, 3, C, C), jnp.float32, -bound, bound)
    b2 = jax.random.uniform(kb2, (C,), jnp.float32, -bound, bound)

    out = resblock_pallas(x, w1, b1, w2, b2)
    out = jax.block_until_ready(out)

    ref = jax.block_until_ready(resblock_reference(x, w1, b1, w2, b2))
    assert out.shape == (N, H, W, C)
    assert jnp.allclose(out, ref, atol=1e-4, rtol=1e-4), "mismatch vs reference"

    print("KERNEL_OK")
</pallas_src>

<mosaic_0001>
module attributes {stable_mosaic.version = 11 : i64} {
  func.func @_resblock_kernel(%arg0: i32, %arg1: memref<2x16x128xf32, #tpu.memory_space<vmem>>, %arg2: memref<384x128xf32, #tpu.memory_space<vmem>>, %arg3: memref<1x128xf32, #tpu.memory_space<vmem>>, %arg4: memref<384x128xf32, #tpu.memory_space<vmem>>, %arg5: memref<1x128xf32, #tpu.memory_space<vmem>>, %arg6: memref<2x16x128xf32, #tpu.memory_space<vmem>>) attributes {dimension_semantics = [#tpu.dimension_semantics<arbitrary>], iteration_bounds = array<i64: 1>, scalar_prefetch = 0 : i64, scratch_operands = 0 : i64, tpu.core_type = #tpu.core_type<tc>, window_params = [{pipeline_mode = #tpu.pipeline_mode<synchronous>, transform_indices = @transform_0, window_bounds = array<i64: 2, 16, 128>}, {pipeline_mode = #tpu.pipeline_mode<synchronous>, transform_indices = @transform_1, window_bounds = array<i64: 384, 128>}, {pipeline_mode = #tpu.pipeline_mode<synchronous>, transform_indices = @transform_2, window_bounds = array<i64: 1, 128>}, {pipeline_mode = #tpu.pipeline_mode<synchronous>, transform_indices = @transform_3, window_bounds = array<i64: 384, 128>}, {pipeline_mode = #tpu.pipeline_mode<synchronous>, transform_indices = @transform_4, window_bounds = array<i64: 1, 128>}, {pipeline_mode = #tpu.pipeline_mode<synchronous>, transform_indices = @transform_5, window_bounds = array<i64: 2, 16, 128>}]} {
    %c0 = arith.constant 0 : index
    %c0_0 = arith.constant 0 : index
    %c0_1 = arith.constant 0 : index
    %0 = vector.load %arg1[%c0, %c0_0, %c0_1] : memref<2x16x128xf32, #tpu.memory_space<vmem>>, vector<2x16x128xf32>
    %cst = arith.constant 0.000000e+00 : f32
    %1 = vector.broadcast %cst : f32 to vector<1x128xf32>
    %cst_2 = arith.constant 0.000000e+00 : f32
    %2 = vector.broadcast %cst_2 : f32 to vector<2x16x128xf32>
    %3 = arith.maximumf %0, %2 : vector<2x16x128xf32>
    %4 = vector.extract_strided_slice %3 {offsets = [0, 0, 0], sizes = [1, 16, 128], strides = [1, 1, 1]} : vector<2x16x128xf32> to vector<1x16x128xf32>
    %5 = vector.shape_cast %4 : vector<1x16x128xf32> to vector<16x128xf32>
    %6 = tpu.concatenate %1, %5, %1 in 0 : vector<1x128xf32>, vector<16x128xf32>, vector<1x128xf32> -> vector<18x128xf32>
    %7 = vector.extract_strided_slice %6 {offsets = [0, 0], sizes = [16, 128], strides = [1, 1]} : vector<18x128xf32> to vector<16x128xf32>
    %8 = vector.extract_strided_slice %6 {offsets = [1, 0], sizes = [16, 128], strides = [1, 1]} : vector<18x128xf32> to vector<16x128xf32>
    %9 = vector.extract_strided_slice %6 {offsets = [2, 0], sizes = [16, 128], strides = [1, 1]} : vector<18x128xf32> to vector<16x128xf32>
    %10 = tpu.concatenate %7, %8, %9 in 1 : vector<16x128xf32>, vector<16x128xf32>, vector<16x128xf32> -> vector<16x384xf32>
    %11 = vector.extract_strided_slice %3 {offsets = [1, 0, 0], sizes = [1, 16, 128], strides = [1, 1, 1]} : vector<2x16x128xf32> to vector<1x16x128xf32>
    %12 = vector.shape_cast %11 : vector<1x16x128xf32> to vector<16x128xf32>
    %13 = tpu.concatenate %1, %12, %1 in 0 : vector<1x128xf32>, vector<16x128xf32>, vector<1x128xf32> -> vector<18x128xf32>
    %14 = vector.extract_strided_slice %13 {offsets = [0, 0], sizes = [16, 128], strides = [1, 1]} : vector<18x128xf32> to vector<16x128xf32>
    %15 = vector.extract_strided_slice %13 {offsets = [1, 0], sizes = [16, 128], strides = [1, 1]} : vector<18x128xf32> to vector<16x128xf32>
    %16 = vector.extract_strided_slice %13 {offsets = [2, 0], sizes = [16, 128], strides = [1, 1]} : vector<18x128xf32> to vector<16x128xf32>
    %17 = tpu.concatenate %14, %15, %16 in 1 : vector<16x128xf32>, vector<16x128xf32>, vector<16x128xf32> -> vector<16x384xf32>
    %18 = tpu.concatenate %10, %17 in 0 : vector<16x384xf32>, vector<16x384xf32> -> vector<32x384xf32>
    %c0_3 = arith.constant 0 : index
    %c0_4 = arith.constant 0 : index
    %19 = vector.load %arg2[%c0_3, %c0_4] : memref<384x128xf32, #tpu.memory_space<vmem>>, vector<384x128xf32>
    %cst_5 = arith.constant dense<0.000000e+00> : vector<32x128xf32>
    %20 = tpu.matmul %18, %19, %cst_5 {dimension_numbers = #tpu.dot_dimension_numbers<[1], [0], [0], [1], [0, 0, 1, 1], [], []>} : vector<32x384xf32>, vector<384x128xf32>, vector<32x128xf32> -> vector<32x128xf32>
    %c0_6 = arith.constant 0 : index
    %c0_7 = arith.constant 0 : index
    %21 = vector.load %arg3[%c0_6, %c0_7] : memref<1x128xf32, #tpu.memory_space<vmem>>, vector<1x128xf32>
    %22 = vector.broadcast %21 : vector<1x128xf32> to vector<32x128xf32>
    %23 = arith.addf %20, %22 : vector<32x128xf32>
    %cst_8 = arith.constant 0.000000e+00 : f32
    %24 = vector.broadcast %cst_8 : f32 to vector<32x128xf32>
    %25 = arith.maximumf %23, %24 : vector<32x128xf32>
    %26 = vector.shape_cast %25 : vector<32x128xf32> to vector<2x16x128xf32>
    %27 = vector.extract_strided_slice %26 {offsets = [0, 0, 0], sizes = [1, 16, 128], strides = [1, 1, 1]} : vector<2x16x128xf32> to vector<1x16x128xf32>
    %28 = vector.shape_cast %27 : vector<1x16x128xf32> to vector<16x128xf32>
    %29 = tpu.concatenate %1, %28, %1 in 0 : vector<1x128xf32>, vector<16x128xf32>, vector<1x128xf32> -> vector<18x128xf32>
    %30 = vector.extract_strided_slice %29 {offsets = [0, 0], sizes = [16, 128], strides = [1, 1]} : vector<18x128xf32> to vector<16x128xf32>
    %31 = vector.extract_strided_slice %29 {offsets = [1, 0], sizes = [16, 128], strides = [1, 1]} : vector<18x128xf32> to vector<16x128xf32>
    %32 = vector.extract_strided_slice %29 {offsets = [2, 0], sizes = [16, 128], strides = [1, 1]} : vector<18x128xf32> to vector<16x128xf32>
    %33 = tpu.concatenate %30, %31, %32 in 1 : vector<16x128xf32>, vector<16x128xf32>, vector<16x128xf32> -> vector<16x384xf32>
    %34 = vector.extract_strided_slice %26 {offsets = [1, 0, 0], sizes = [1, 16, 128], strides = [1, 1, 1]} : vector<2x16x128xf32> to vector<1x16x128xf32>
    %35 = vector.shape_cast %34 : vector<1x16x128xf32> to vector<16x128xf32>
    %36 = tpu.concatenate %1, %35, %1 in 0 : vector<1x128xf32>, vector<16x128xf32>, vector<1x128xf32> -> vector<18x128xf32>
    %37 = vector.extract_strided_slice %36 {offsets = [0, 0], sizes = [16, 128], strides = [1, 1]} : vector<18x128xf32> to vector<16x128xf32>
    %38 = vector.extract_strided_slice %36 {offsets = [1, 0], sizes = [16, 128], strides = [1, 1]} : vector<18x128xf32> to vector<16x128xf32>
    %39 = vector.extract_strided_slice %36 {offsets = [2, 0], sizes = [16, 128], strides = [1, 1]} : vector<18x128xf32> to vector<16x128xf32>
    %40 = tpu.concatenate %37, %38, %39 in 1 : vector<16x128xf32>, vector<16x128xf32>, vector<16x128xf32> -> vector<16x384xf32>
    %41 = tpu.concatenate %33, %40 in 0 : vector<16x384xf32>, vector<16x384xf32> -> vector<32x384xf32>
    %c0_9 = arith.constant 0 : index
    %c0_10 = arith.constant 0 : index
    %42 = vector.load %arg4[%c0_9, %c0_10] : memref<384x128xf32, #tpu.memory_space<vmem>>, vector<384x128xf32>
    %cst_11 = arith.constant dense<0.000000e+00> : vector<32x128xf32>
    %43 = tpu.matmul %41, %42, %cst_11 {dimension_numbers = #tpu.dot_dimension_numbers<[1], [0], [0], [1], [0, 0, 1, 1], [], []>} : vector<32x384xf32>, vector<384x128xf32>, vector<32x128xf32> -> vector<32x128xf32>
    %c0_12 = arith.constant 0 : index
    %c0_13 = arith.constant 0 : index
    %44 = vector.load %arg5[%c0_12, %c0_13] : memref<1x128xf32, #tpu.memory_space<vmem>>, vector<1x128xf32>
    %45 = vector.broadcast %44 : vector<1x128xf32> to vector<32x128xf32>
    %46 = arith.addf %43, %45 : vector<32x128xf32>
    %47 = vector.shape_cast %0 : vector<2x16x128xf32> to vector<32x128xf32>
    %48 = arith.addf %47, %46 : vector<32x128xf32>
    %49 = vector.shape_cast %48 : vector<32x128xf32> to vector<2x16x128xf32>
    %c0_14 = arith.constant 0 : index
    %c0_15 = arith.constant 0 : index
    %c0_16 = arith.constant 0 : index
    %50 = vector.load %arg6[%c0_14, %c0_15, %c0_16] : memref<2x16x128xf32, #tpu.memory_space<vmem>>, vector<2x16x128xf32>
    tpu.vector_store %arg6[%c0_14, %c0_15, %c0_16], %49 {strides = array<i32>} : memref<2x16x128xf32, #tpu.memory_space<vmem>>, vector<2x16x128xf32>,
    return
  }
  func.func @transform_0(%arg0: i32) -> (i32, i32, i32) {
    %c0_i32 = arith.constant 0 : i32
    %c0_i32_0 = arith.constant 0 : i32
    %c0_i32_1 = arith.constant 0 : i32
    %c0_i32_2 = arith.constant 0 : i32
    return %c0_i32, %c0_i32_0, %c0_i32_1 : i32, i32, i32
  }
  func.func @transform_1(%arg0: i32) -> (i32, i32) {
    %c0_i32 = arith.constant 0 : i32
    %c0_i32_0 = arith.constant 0 : i32
    %c0_i32_1 = arith.constant 0 : i32
    return %c0_i32, %c0_i32_0 : i32, i32
  }
  func.func @transform_2(%arg0: i32) -> (i32, i32) {
    %c0_i32 = arith.constant 0 : i32
    %c0_i32_0 = arith.constant 0 : i32
    %c0_i32_1 = arith.constant 0 : i32
    return %c0_i32, %c0_i32_0 : i32, i32
  }
  func.func @transform_3(%arg0: i32) -> (i32, i32) {
    %c0_i32 = arith.constant 0 : i32
    %c0_i32_0 = arith.constant 0 : i32
    %c0_i32_1 = arith.constant 0 : i32
    return %c0_i32, %c0_i32_0 : i32, i32
  }
  func.func @transform_4(%arg0: i32) -> (i32, i32) {
    %c0_i32 = arith.constant 0 : i32
    %c0_i32_0 = arith.constant 0 : i32
    %c0_i32_1 = arith.constant 0 : i32
    return %c0_i32, %c0_i32_0 : i32, i32
  }
  func.func @transform_5(%arg0: i32) -> (i32, i32, i32) {
    %c0_i32 = arith.constant 0 : i32
    %c0_i32_0 = arith.constant 0 : i32
    %c0_i32_1 = arith.constant 0 : i32
    %c0_i32_2 = arith.constant 0 : i32
    return %c0_i32, %c0_i32_0, %c0_i32_1 : i32, i32, i32
  }
}

</mosaic_0001>

<bundles_post_ra>
// kernel: tile.13
= control target key start
LH: loop header
LB: loop body
LE: loop exit
PB: predicated region body
PF: predicated region fallthrough
CT: control target
= control target key end

     0   :  { %s28_s0 = inlined_call_operand.vmem [shape: f32[8], index: 0, kind: input, shape index: {}]   ;;  %s29_s1 = inlined_call_operand.vmem [shape: f32[16,8], index: 1, kind: output, shape index: {}]  }
   0x1   :  { %v4_v0 = vld [vmem:[%s28_s0] ss:$0 sm:$0xff] }
   0x2   :  { %5 = vst [vmem:[%s29_s1] sm:$0xff] %v4_v0  ;;  %8 = vst [vmem:[%s29_s1 + $0x8] sm:$0xff] %v4_v0 }

// kernel: tile.14
= control target key start
LH: loop header
LB: loop body
LE: loop exit
PB: predicated region body
PF: predicated region fallthrough
CT: control target
= control target key end

     0   :  { %s131_s10 = smov 120   ;;  %s132_s11 = smov 104   ;;  %vm3_vm0 = vcmask 64512   ;;  %vm9_vm1 = vcmask 1048512   ;;  %vm15_vm2 = vcmask 982912   ;;  %vm21_vm3 = vcmask 917312   ;;  %s207_s0 = inlined_call_operand.vmem [shape: f32[16,8], index: 0, kind: input, shape index: {}]   ;;  %s208_s1 = inlined_call_operand.vmem [shape: f32[1,128], index: 1, kind: output, shape index: {}]  }
   0x1   :  { %v101_v0 = vld [vmem:[%s207_s0 + $0xf] sm:$0x1]   ;;  %v103_v1 = vld [vmem:[%s207_s0 + $0xd] sm:$0x1]   ;;  %v102_v2 = vld [vmem:[%s207_s0 + $0xe] sm:$0x1]  }
   0x2   :  { %7 = vrot.lane.b32.xlu0 %v101_v0, %s131_s10  ;;  %19 = vrot.lane.b32.xlu1 %v103_v1, %s132_s11  ;;  %v104_v3 = vld [vmem:[%s207_s0 + $0xc] sm:$0x1]   ;;  %s133_s16 = smov 112   ;;  %s134_s17 = smov 96   ;;  %v105_v4 = vld [vmem:[%s207_s0 + $0xb] sm:$0x1]  }
   0x3   :  { %v106_v5 = vld [vmem:[%s207_s0 + $0xa] sm:$0x1]   ;;  %v2_v6 = vld [vmem:[%s207_s0] sm:$0x1]   ;;  %s135_s24 = smov 88   ;;  %s136_s25 = smov 80  }
   0x4   :  { %4 = vst.msk [vmem:[#allocation0] sm:$0x1] %vm3_vm0, %v2_v6   ;;  %v107_v7 = vld [vmem:[%s207_s0 + $0x9] sm:$0x1]   ;;  %v108_v8 = vld [vmem:[%s207_s0 + $0x8] sm:$0x1]  }
   0x5   :  { %s137_s30 = smov 72   ;;  %s138_s2 = smov 64   ;;  %v109_v9 = vld [vmem:[%s207_s0 + $0x7] sm:$0x1]   ;;  %v110_v10 = vld [vmem:[%s207_s0 + $0x6] sm:$0x1]  }
   0x6   :  { %13 = vrot.lane.b32.xlu0 %v102_v2, %s133_s16  ;;  %25 = vrot.lane.b32.xlu1 %v104_v3, %s134_s17  ;;  %s139_s7 = smov 56   ;;  %s140_s8 = smov 48   ;;  %v111_v11 = vld [vmem:[%s207_s0 + $0x5] sm:$0x1]   ;;  %v112_v12 = vld [vmem:[%s207_s0 + $0x4] sm:$0x1]  }
   0x7   :  { %s141_s13 = smov 40   ;;  %s142_s14 = smov 32   ;;  %v113_v13 = vld [vmem:[%s207_s0 + $0x3] sm:$0x1]   ;;  %v114_v14 = vld [vmem:[%s207_s0 + $0x2] sm:$0x1]  }
   0x8   :  { %s143_s19 = smov 24   ;;  %s144_s20 = smov 16   ;;  %v115_v15 = vld [vmem:[%s207_s0 + $0x1] sm:$0x1]   ;;  %vm27_vm4 = vcmask 851712   ;;  %vm33_vm5 = vcmask 786112  }
   0x9   :  { %s145_s0 = smov 8   ;;  %vm39_vm6 = vcmask 720512   ;;  %vm45_vm7 = vcmask 654912   ;;  %vm51_vm8 = vcmask 589312   ;;  %vm57_vm9 = vcmask 523712  }
   0xa   :  { %31 = vrot.lane.b32.xlu0 %v105_v4, %s135_s24  ;;  %37 = vrot.lane.b32.xlu1 %v106_v5, %s136_s25  ;;  %vm63_vm10 = vcmask 458112   ;;  %vm69_vm11 = vcmask 392512   ;;  %vm75_vm12 = vcmask 326912   ;;  %vm81_vm13 = vcmask 261312  }
   0xb   :  { %vm87_vm14 = vcmask 195712   ;;  %vm93_vm15 = vcmask 130112  }
   0xe   :  { %43 = vrot.lane.b32.xlu0 %v107_v7, %s137_s30  ;;  %49 = vrot.lane.b32.xlu1 %v108_v8, %s138_s2 }
  0x12   :  { %55 = vrot.lane.b32.xlu0 %v109_v9, %s139_s7  ;;  %61 = vrot.lane.b32.xlu1 %v110_v10, %s140_s8 }
  0x16   :  { %67 = vrot.lane.b32.xlu0 %v111_v11, %s141_s13  ;;  %73 = vrot.lane.b32.xlu1 %v112_v12, %s142_s14 }
  0x1a   :  { %79 = vrot.lane.b32.xlu0 %v113_v13, %s143_s19  ;;  %85 = vrot.lane.b32.xlu1 %v114_v14, %s144_s20 }
  0x1e   :  { %91 = vrot.lane.b32.xlu0 %v115_v15, %s145_s0 }
  0x74   :  { %v8_v16 = vpop.permute.xlu0 %7   ;;  %v20_v17 = vpop.permute.xlu1 %19  }
  0x75   :  { %10 = vst.msk [vmem:[#allocation0] sm:$0x1] %vm9_vm1, %v8_v16  }
  0x78   :  { %v14_v18 = vpop.permute.xlu0 %13   ;;  %v26_v19 = vpop.permute.xlu1 %25  }
  0x79   :  { %16 = vst.msk [vmem:[#allocation0] sm:$0x1] %vm15_vm2, %v14_v18  }
  0x7a   :  { %22 = vst.msk [vmem:[#allocation0] sm:$0x1] %vm21_vm3, %v20_v17  }
  0x7b   :  { %28 = vst.msk [vmem:[#allocation0] sm:$0x1] %vm27_vm4, %v26_v19  }
  0x7c   :  { %v32_v20 = vpop.permute.xlu0 %31   ;;  %v38_v21 = vpop.permute.xlu1 %37  }
  0x7d   :  { %34 = vst.msk [vmem:[#allocation0] sm:$0x1] %vm33_vm5, %v32_v20  }
  0x7e   :  { %40 = vst.msk [vmem:[#allocation0] sm:$0x1] %vm39_vm6, %v38_v21  }
  0x80   :  { %v44_v22 = vpop.permute.xlu0 %43   ;;  %v50_v23 = vpop.permute.xlu1 %49  }
  0x81   :  { %46 = vst.msk [vmem:[#allocation0] sm:$0x1] %vm45_vm7, %v44_v22  }
  0x82   :  { %52 = vst.msk [vmem:[#allocation0] sm:$0x1] %vm51_vm8, %v50_v23  }
  0x84   :  { %v56_v24 = vpop.permute.xlu0 %55   ;;  %v62_v25 = vpop.permute.xlu1 %61  }
  0x85   :  { %58 = vst.msk [vmem:[#allocation0] sm:$0x1] %vm57_vm9, %v56_v24  }
  0x86   :  { %64 = vst.msk [vmem:[#allocation0] sm:$0x1] %vm63_vm10, %v62_v25  }
  0x88   :  { %v68_v26 = vpop.permute.xlu0 %67   ;;  %v74_v27 = vpop.permute.xlu1 %73  }
  0x89   :  { %70 = vst.msk [vmem:[#allocation0] sm:$0x1] %vm69_vm11, %v68_v26  }
  0x8a   :  { %76 = vst.msk [vmem:[#allocation0] sm:$0x1] %vm75_vm12, %v74_v27  }
  0x8c   :  { %v80_v28 = vpop.permute.xlu0 %79   ;;  %v86_v29 = vpop.permute.xlu1 %85  }
  0x8d   :  { %82 = vst.msk [vmem:[#allocation0] sm:$0x1] %vm81_vm13, %v80_v28  }
  0x8e   :  { %88 = vst.msk [vmem:[#allocation0] sm:$0x1] %vm87_vm14, %v86_v29  }
  0x90   :  { %v92_v30 = vpop.permute.xlu0 %91  }
  0x91   :  { %94 = vst.msk [vmem:[#allocation0] sm:$0x1] %vm93_vm15, %v92_v30  }
  0x98   :  { %v98_v31 = vld [vmem:[#allocation0] sm:$0x1] }
  0x99   :  { %100 = vst [vmem:[%s208_s1] sm:$0x1] %v98_v31 }

// kernel: resblock_pallas.1
= control target key start
LH: loop header
LB: loop body
LE: loop exit
PB: predicated region body
PF: predicated region fallthrough
CT: control target
= control target key end

     0   :  { %vm30_vm0 = vcmask 1040384   ;;  %vm41_vm1 = vcmask 1046528   ;;  %vm49_vm2 = vcmask 1045504   ;;  %s1363_s1 = inlined_call_operand.vmem [shape: f32[384,128], index: 1, kind: input, shape index: {}]   ;;  %s1364_s0 = inlined_call_operand.vmem [shape: f32[2,16,128], index: 0, kind: input, shape index: {}]   ;;  %s1365_s3 = inlined_call_operand.vmem [shape: f32[384,128], index: 3, kind: input, shape index: {}]   ;;  %s1366_s2 = inlined_call_operand.vmem [shape: f32[1,128], index: 2, kind: input, shape index: {}]   ;;  %s1367_s4 = inlined_call_operand.vmem [shape: f32[1,128], index: 4, kind: input, shape index: {}]   ;;  %s1368_s5 = inlined_call_operand.vmem [shape: f32[2,16,128], index: 5, kind: output, shape index: {}]  }
   0x1   :  { %v99_v0 = vld [vmem:[%s1363_s1 + $0x80] sm:$0xff]  ;;  %v100_v1 = vld [vmem:[%s1363_s1 + $0x88] sm:$0xff]  ;;  %v101_v5 = vld [vmem:[%s1363_s1 + $0x90] sm:$0xff] }
   0x2   :  { %v83_v2 = vld [vmem:[%s1363_s1] sm:$0xff]  ;;  %v815_v3 = vpack.c.bf16 %v100_v1, %v99_v0  ;;  %v84_v4 = vld [vmem:[%s1363_s1 + $0x8] sm:$0xff]  ;;  %v102_v6 = vld [vmem:[%s1363_s1 + $0x98] sm:$0xff] }
   0x3   :  { %v817_v7 = vpack.c.bf16 %v84_v4, %v83_v2  ;;  %v819_v8 = vpack.c.bf16 %v102_v6, %v101_v5  ;;  %v115_v9 = vld [vmem:[%s1363_s1 + $0x100] sm:$0xff]  ;;  %v116_v10 = vld [vmem:[%s1363_s1 + $0x108] sm:$0xff]  ;;  %v85_v11 = vld [vmem:[%s1363_s1 + $0x10] sm:$0xff] }
   0x4   :  { %816 = vmatprep.subr.bf16.mxu0 %v815_v3  ;;  %v847_v12 = vpack.c.bf16 %v116_v10, %v115_v9  ;;  %v86_v13 = vld [vmem:[%s1363_s1 + $0x18] sm:$0xff]  ;;  %v103_v14 = vld [vmem:[%s1363_s1 + $0xa0] sm:$0xff]  ;;  %v104_v15 = vld [vmem:[%s1363_s1 + $0xa8] sm:$0xff] }
   0x5   :  { %818 = vmatpush3.bf16.msra.mxu0 %v817_v7  ;;  %v821_v16 = vpack.c.bf16 %v86_v13, %v85_v11  ;;  %v117_v17 = vld [vmem:[%s1363_s1 + $0x110] sm:$0xff]  ;;  %v118_v18 = vld [vmem:[%s1363_s1 + $0x118] sm:$0xff]  ;;  %v823_v19 = vpack.c.bf16 %v104_v15, %v103_v14  ;;  %v87_v21 = vld [vmem:[%s1363_s1 + $0x20] sm:$0xff] }
   0x6   :  { %820 = vmatprep.subr.bf16.mxu0 %v819_v8  ;;  %848 = vmatprep.subr.bf16.mxu1 %v847_v12  ;;  %v851_v20 = vpack.c.bf16 %v118_v18, %v117_v17  ;;  %v88_v22 = vld [vmem:[%s1363_s1 + $0x28] sm:$0xff]  ;;  %v105_v23 = vld [vmem:[%s1363_s1 + $0xb0] sm:$0xff]  ;;  %v106_v24 = vld [vmem:[%s1363_s1 + $0xb8] sm:$0xff] }
   0x7   :  { %850 = vmatpush3.bf16.msra.mxu1 %v847_v12  ;;  %v119_v25 = vld [vmem:[%s1363_s1 + $0x120] sm:$0xff]  ;;  %v120_v26 = vld [vmem:[%s1363_s1 + $0x128] sm:$0xff]  ;;  %v825_v28 = vpack.c.bf16 %v88_v22, %v87_v21  ;;  %v121_v29 = vld [vmem:[%s1363_s1 + $0x130] sm:$0xff]  ;;  %v827_v31 = vpack.c.bf16 %v106_v24, %v105_v23 }
   0x8   :  { %852 = vmatprep.subr.bf16.mxu1 %v851_v20  ;;  %v855_v27 = vpack.c.bf16 %v120_v26, %v119_v25  ;;  %v122_v30 = vld [vmem:[%s1363_s1 + $0x138] sm:$0xff]  ;;  %v89_v32 = vld [vmem:[%s1363_s1 + $0x30] sm:$0xff]  ;;  %v107_v34 = vld [vmem:[%s1363_s1 + $0xc0] sm:$0xff] }
   0x9   :  { %822 = vmatpush3.bf16.msra.mxu0 %v821_v16  ;;  %v90_v33 = vld [vmem:[%s1363_s1 + $0x38] sm:$0xff]  ;;  %v108_v35 = vld [vmem:[%s1363_s1 + $0xc8] sm:$0xff]  ;;  %v859_v36 = vpack.c.bf16 %v122_v30, %v121_v29  ;;  %v123_v38 = vld [vmem:[%s1363_s1 + $0x140] sm:$0xff] }
   0xa   :  { %824 = vmatprep.subr.bf16.mxu0 %v823_v19  ;;  %v829_v37 = vpack.c.bf16 %v90_v33, %v89_v32  ;;  %v124_v39 = vld [vmem:[%s1363_s1 + $0x148] sm:$0xff]  ;;  %v831_v40 = vpack.c.bf16 %v108_v35, %v107_v34  ;;  %v91_v41 = vld [vmem:[%s1363_s1 + $0x40] sm:$0xff]  ;;  %v109_v43 = vld [vmem:[%s1363_s1 + $0xd0] sm:$0xff] }
   0xb   :  { %854 = vmatpush3.bf16.msra.mxu1 %v851_v20  ;;  %v92_v42 = vld [vmem:[%s1363_s1 + $0x48] sm:$0xff]  ;;  %v110_v44 = vld [vmem:[%s1363_s1 + $0xd8] sm:$0xff]  ;;  %v863_v45 = vpack.c.bf16 %v124_v39, %v123_v38  ;;  %v1072_v46 = vld [vmem:[%s1364_s0] sm:$0xff] }
   0xc   :  { %856 = vmatprep.subr.bf16.mxu1 %v855_v27  ;;  %v1077_v47 = vld [vmem:[%s1364_s0 + $0x8] sm:$0xff]  ;;  %v833_v48 = vpack.c.bf16 %v92_v42, %v91_v41  ;;  %v125_v49 = vld [vmem:[%s1363_s1 + $0x150] sm:$0xff]  ;;  %v126_v50 = vld [vmem:[%s1363_s1 + $0x158] sm:$0xff]  ;;  %v24_v51 = vmax.f32 %v1072_v46, 0.0  ;;  %v835_v53 = vpack.c.bf16 %v110_v44, %v109_v43 }
   0xd   :  { %826 = vmatpush3.bf16.msra.mxu0 %v825_v28  ;;  %v25_v52 = vmax.f32 %v1077_v47, 0.0  ;;  %v93_v54 = vld [vmem:[%s1363_s1 + $0x50] sm:$0xff]  ;;  %v94_v55 = vld [vmem:[%s1363_s1 + $0x58] sm:$0xff]  ;;  %v111_v56 = vld [vmem:[%s1363_s1 + $0xe0] sm:$0xff]  ;;  %v867_v60 = vpack.c.bf16 %v126_v50, %v125_v49 }
   0xe   :  { %828 = vmatprep.subr.bf16.mxu0 %v827_v31  ;;  %v112_v57 = vld [vmem:[%s1363_s1 + $0xe8] sm:$0xff]  ;;  %v1099_v58 = vrot.slane %v24_v51, 7  ;;  %v1104_v61 = vld [vmem:[%s1364_s0 + $0x10] sm:$0xff]  ;;  %v1109_v62 = vld [vmem:[%s1364_s0 + $0x18] sm:$0xff]  ;;  %v837_v63 = vpack.c.bf16 %v94_v55, %v93_v54 }
   0xf   :  { %858 = vmatpush3.bf16.msra.mxu1 %v855_v27  ;;  %v32_v59 = vrot.slane %v25_v52, 7  ;;  %v127_v0 = vld [vmem:[%s1363_s1 + $0x160] sm:$0xff]  ;;  %v128_v1 = vld [vmem:[%s1363_s1 + $0x168] sm:$0xff]  ;;  %v839_v4 = vpack.c.bf16 %v112_v57, %v111_v56  ;;  %v113_v10 = vld [vmem:[%s1363_s1 + $0xf0] sm:$0xff]  ;;  %v26_v13 = vmax.f32 %v1104_v61, 0.0  ;;  %v27_v14 = vmax.f32 %v1109_v62, 0.0 }
  0x10   :  { %860 = vmatprep.subr.bf16.mxu1 %v859_v36  ;;  %v37_v3 = vsel %vm30_vm0, 0.0, %v1099_v58  ;;  %v95_v5 = vld [vmem:[%s1363_s1 + $0x60] sm:$0xff]  ;;  %v96_v6 = vld [vmem:[%s1363_s1 + $0x68] sm:$0xff]  ;;  %v114_v11 = vld [vmem:[%s1363_s1 + $0xf8] sm:$0xff]  ;;  %v871_v15 = vpack.c.bf16 %v128_v1, %v127_v0 }
  0x11   :  { %830 = vmatpush3.bf16.msra.mxu0 %v829_v37  ;;  %v1119_v2 = vsel %vm30_vm0, %v1099_v58, %v32_v59  ;;  %v42_v7 = vrot.slane %v37_v3, 1  ;;  %v50_v9 = vrot.slane %v37_v3, 2  ;;  %v841_v17 = vpack.c.bf16 %v96_v6, %v95_v5  ;;  %v129_v18 = vld [vmem:[%s1363_s1 + $0x170] sm:$0xff]  ;;  %v130_v19 = vld [vmem:[%s1363_s1 + $0x178] sm:$0xff]  ;;  %v380_v27 = vld [vmem:[%s1365_s3 + $0x80] sm:$0xff] }
  0x12   :  { %832 = vmatprep.subr.bf16.mxu0 %v831_v40  ;;  %v43_v8 = vrot.slane %v1119_v2, 1  ;;  %v51_v12 = vrot.slane %v1119_v2, 2  ;;  %v843_v21 = vpack.c.bf16 %v114_v11, %v113_v10  ;;  %v97_v22 = vld [vmem:[%s1363_s1 + $0x70] sm:$0xff]  ;;  %v98_v23 = vld [vmem:[%s1363_s1 + $0x78] sm:$0xff]  ;;  %v38_v24 = vsel %vm30_vm0, %v32_v59, 0.0  ;;  %v381_v28 = vld [vmem:[%s1365_s3 + $0x88] sm:$0xff] }
  0x13   :  { %862 = vmatpush3.bf16.msra.mxu1 %v859_v36  ;;  %v1154_v25 = vrot.slane %v26_v13, 7  ;;  %v60_v26 = vrot.slane %v27_v14, 7  ;;  %v875_v29 = vpack.c.bf16 %v130_v19, %v129_v18  ;;  %v845_v30 = vpack.c.bf16 %v98_v23, %v97_v22  ;;  %v396_v31 = vld [vmem:[%s1365_s3 + $0x100] sm:$0xff]  ;;  %v397_v32 = vld [vmem:[%s1365_s3 + $0x108] sm:$0xff]  ;;  %v382_v40 = vld [vmem:[%s1365_s3 + $0x90] sm:$0xff] }
  0x14   :  { %864 = vmatprep.subr.bf16.mxu1 %v863_v45  ;;  %v44_v16 = vsel %vm41_vm1, %v42_v7, %v43_v8  ;;  %v52_v20 = vsel %vm49_vm2, %v50_v9, %v51_v12  ;;  %v45_v33 = vrot.slane %v38_v24, 1  ;;  %v879_v34 = vpack.c.bf16 %v381_v28, %v380_v27  ;;  %v364_v35 = vld [vmem:[%s1365_s3] sm:$0xff]  ;;  %v365_v36 = vld [vmem:[%s1365_s3 + $0x8] sm:$0xff]  ;;  %v383_v41 = vld [vmem:[%s1365_s3 + $0x98] sm:$0xff] }
  0x15   :  { %834 = vmatpush3.bf16.msra.mxu0 %v833_v48  ;;  %202 = vmatprep.mubr.f32.mxu0 %v44_v16  ;;  %v53_v37 = vrot.slane %v38_v24, 2  ;;  %v61_v38 = vsel %vm30_vm0, %v1154_v25, %v60_v26  ;;  %v65_v39 = vsel %vm30_vm0, 0.0, %v1154_v25  ;;  %v66_v42 = vsel %vm30_vm0, %v60_v26, 0.0  ;;  %vm1186_vm3 = vmneg %vm30_vm0  ;;  %v398_v50 = vld [vmem:[%s1365_s3 + $0x110] sm:$0xff]  ;;  %v399_v51 = vld [vmem:[%s1365_s3 + $0x118] sm:$0xff] }
  0x16   :  { %836 = vmatprep.subr.bf16.mxu0 %v835_v53  ;;  %771 = vmatprep.mubr.f32.mxu1 %v52_v20  ;;  %v76_v43 = vrot.slane %v65_v39, 2  ;;  %v77_v44 = vrot.slane %v61_v38, 2  ;;  %v881_v49 = vpack.c.bf16 %v365_v36, %v364_v35  ;;  %v46_v52 = vsel %vm41_vm1, %v43_v8, %v45_v33  ;;  %v366_v56 = vld [vmem:[%s1365_s3 + $0x10] sm:$0xff]  ;;  %v367_v57 = vld [vmem:[%s1365_s3 + $0x18] sm:$0xff]  ;;  %v385_v0 = vld [vmem:[%s1365_s3 + $0xa8] sm:$0xff] }
  0x17   :  { %866 = vmatpush3.bf16.msra.mxu1 %v863_v45  ;;  %v911_v45 = vpack.c.bf16 %v397_v32, %v396_v31  ;;  %v69_v53 = vrot.slane %v65_v39, 1  ;;  %v70_v54 = vrot.slane %v61_v38, 1  ;;  %v883_v55 = vpack.c.bf16 %v383_v41, %v382_v40  ;;  %v400_v5 = vld [vmem:[%s1365_s3 + $0x120] sm:$0xff]  ;;  %v401_v6 = vld [vmem:[%s1365_s3 + $0x128] sm:$0xff]  ;;  %v402_v16 = vld [vmem:[%s1365_s3 + $0x130] sm:$0xff] }
  0x18   :  { %868 = vmatprep.subr.bf16.mxu1 %v867_v60  ;;  %v54_v59 = vsel %vm49_vm2, %v51_v12, %v53_v37  ;;  %v78_v1 = vsel %vm49_vm2, %v76_v43, %v77_v44  ;;  %v915_v3 = vpack.c.bf16 %v399_v51, %v398_v50  ;;  %v72_v8 = vrot.slane %v66_v42, 1  ;;  %v368_v9 = vld [vmem:[%s1365_s3 + $0x20] sm:$0xff]  ;;  %v369_v10 = vld [vmem:[%s1365_s3 + $0x28] sm:$0xff]  ;;  %v403_v18 = vld [vmem:[%s1365_s3 + $0x138] sm:$0xff] }
  0x19   :  { %838 = vmatpush3.bf16.msra.mxu0 %v837_v63  ;;  %v384_v63 = vld [vmem:[%s1365_s3 + $0xa0] sm:$0xff]  ;;  %v71_v7 = vsel %vm41_vm1, %v69_v53, %v70_v54  ;;  %v919_v12 = vpack.c.bf16 %v401_v6, %v400_v5  ;;  %v889_v13 = vpack.c.bf16 %v369_v10, %v368_v9  ;;  %v370_v19 = vld [vmem:[%s1365_s3 + $0x30] sm:$0xff]  ;;  %v371_v20 = vld [vmem:[%s1365_s3 + $0x38] sm:$0xff] }
  0x1a   :  { %840 = vmatprep.subr.bf16.mxu0 %v839_v4  ;;  %v885_v4 = vpack.c.bf16 %v367_v57, %v366_v56  ;;  %v73_v14 = vsel %vm41_vm1, %v70_v54, %v72_v8  ;;  %v893_v22 = vpack.c.bf16 %v371_v20, %v370_v19  ;;  %v388_v23 = vld [vmem:[%s1365_s3 + $0xc0] sm:$0xff]  ;;  %v389_v24 = vld [vmem:[%s1365_s3 + $0xc8] sm:$0xff]  ;;  %v390_v32 = vld [vmem:[%s1365_s3 + $0xd0] sm:$0xff] }
  0x1b   :  { %870 = vmatpush3.bf16.msra.mxu1 %v867_v60  ;;  %v79_v60 = vrot.slane %v66_v42, 2  ;;  %v895_v26 = vpack.c.bf16 %v389_v24, %v388_v23  ;;  %v405_v27 = vld [vmem:[%s1365_s3 + $0x148] sm:$0xff]  ;;  %v372_v28 = vld [vmem:[%s1365_s3 + $0x40] sm:$0xff]  ;;  %v391_v33 = vld [vmem:[%s1365_s3 + $0xd8] sm:$0xff] }
  0x1c   :  { %872 = vmatprep.subr.bf16.mxu1 %v871_v15  ;;  %v899_v35 = vpack.c.bf16 %v391_v33, %v390_v32  ;;  %v407_v36 = vld [vmem:[%s1365_s3 + $0x158] sm:$0xff]  ;;  %v374_v37 = vld [vmem:[%s1365_s3 + $0x50] sm:$0xff]  ;;  %v392_v41 = vld [vmem:[%s1365_s3 + $0xe0] sm:$0xff] }
  0x1d   :  { %842 = vmatpush3.bf16.msra.mxu0 %v841_v17  ;;  %v80_v11 = vsel %vm49_vm2, %v77_v44, %v79_v60  ;;  %v393_v42 = vld [vmem:[%s1365_s3 + $0xe8] sm:$0xff]  ;;  %v408_v43 = vld [vmem:[%s1365_s3 + $0x160] sm:$0xff]  ;;  %v394_v53 = vld [vmem:[%s1365_s3 + $0xf0] sm:$0xff] }
  0x1e   :  { %844 = vmatprep.subr.bf16.mxu0 %v843_v21  ;;  %v923_v21 = vpack.c.bf16 %v403_v18, %v402_v16  ;;  %v903_v44 = vpack.c.bf16 %v393_v42, %v392_v41  ;;  %v377_v50 = vld [vmem:[%s1365_s3 + $0x68] sm:$0xff]  ;;  %v395_v54 = vld [vmem:[%s1365_s3 + $0xf8] sm:$0xff] }
  0x1f   :  { %874 = vmatpush3.bf16.msra.mxu1 %v871_v15  ;;  %v387_v15 = vld [vmem:[%s1365_s3 + $0xb8] sm:$0xff]  ;;  %v907_v56 = vpack.c.bf16 %v395_v54, %v394_v53 }
  0x20   :  { %876 = vmatprep.subr.bf16.mxu1 %v875_v29  ;;  %v411_v57 = vld [vmem:[%s1365_s3 + $0x178] sm:$0xff] }
  0x21   :  { %846 = vmatpush3.bf16.msra.mxu0 %v845_v30  ;;  %v373_v30 = vld [vmem:[%s1365_s3 + $0x48] sm:$0xff]  ;;  %v379_v60 = vld [vmem:[%s1365_s3 + $0x78] sm:$0xff] }
  0x22   :  { %880 = vmatprep.subr.bf16.mxu0 %v879_v34  ;;  %v897_v31 = vpack.c.bf16 %v373_v30, %v372_v28  ;;  %v406_v34 = vld [vmem:[%s1365_s3 + $0x150] sm:$0xff] }
  0x23   :  { %878 = vmatpush3.bf16.msra.mxu1 %v875_v29  ;;  %v931_v39 = vpack.c.bf16 %v407_v36, %v406_v34 }
  0x24   :  { %603 = vmatmul.mubr.msk.f32.vlgmr.msra.gmra.mrb[0].mxu0 %vm1186_vm3, %v1099_v58  ;;  %912 = vmatprep.subr.bf16.mxu1 %v911_v45  ;;  %v887_v58 = vpack.c.bf16 %v385_v0, %v384_v63 }
  0x25   :  { %207 = vmatprep.mubr.f32.mxu0 %v46_v52  ;;  %882 = vmatpush3.bf16.msra.mxu0 %v881_v49  ;;  %v376_v49 = vld [vmem:[%s1365_s3 + $0x60] sm:$0xff] }
  0x26   :  { %772 = vmatmul.mubr.f32.vlgmr.msra.gmra.mrb[0].mxu1 %v54_v59  ;;  %884 = vmatprep.subr.bf16.mxu0 %v883_v55  ;;  %v905_v52 = vpack.c.bf16 %v377_v50, %v376_v49  ;;  %v410_v55 = vld [vmem:[%s1365_s3 + $0x170] sm:$0xff] }
  0x27   :  { %774 = vmatprep.mubr.f32.mxu1 %v78_v1  ;;  %914 = vmatpush3.bf16.msra.mxu1 %v911_v45  ;;  %v409_v45 = vld [vmem:[%s1365_s3 + $0x168] sm:$0xff]  ;;  %v378_v59 = vld [vmem:[%s1365_s3 + $0x70] sm:$0xff]  ;;  %v939_v63 = vpack.c.bf16 %v411_v57, %v410_v55 }
  0x28   :  { %208 = vmatmul.mubr.f32.gmra.mrb[2].mxu0 %v1119_v2  ;;  %916 = vmatprep.subr.bf16.mxu1 %v915_v3  ;;  %v386_v2 = vld [vmem:[%s1365_s3 + $0xb0] sm:$0xff]  ;;  %v935_v51 = vpack.c.bf16 %v409_v45, %v408_v43  ;;  %v909_v0 = vpack.c.bf16 %v379_v60, %v378_v59 }
  0x29   :  { %212 = vmatprep.mubr.f32.mxu0 %v71_v7  ;;  %886 = vmatpush3.bf16.msra.mxu0 %v885_v4  ;;  %v891_v17 = vpack.c.bf16 %v387_v15, %v386_v2  ;;  %v601_v4 = vld [vmem:[%s1366_s2] ss:$0 sm:$0xff] }
  0x2a   :  { %775 = vmatmul.mubr.f32.gmra.mrb[2].mxu1 %v80_v11  ;;  %888 = vmatprep.subr.bf16.mxu0 %v887_v58 }
  0x2b   :  { %918 = vmatpush3.bf16.msra.mxu1 %v915_v3 }
  0x2c   :  { %605 = vmatmul.mubr.msk.f32.gmra.mrb[4].mxu0 %vm1186_vm3, %v1154_v25  ;;  %920 = vmatprep.subr.bf16.mxu1 %v919_v12  ;;  %v404_v25 = vld [vmem:[%s1365_s3 + $0x140] sm:$0xff] }
  0x2d   :  { %217 = vmatprep.mubr.f32.mxu0 %v73_v14  ;;  %890 = vmatpush3.bf16.msra.mxu0 %v889_v13  ;;  %v927_v29 = vpack.c.bf16 %v405_v27, %v404_v25 }
  0x2e   :  { %892 = vmatprep.subr.bf16.mxu0 %v891_v17 }
  0x2f   :  { %922 = vmatpush3.bf16.msra.mxu1 %v919_v12 }
  0x30   :  { %218 = vmatmul.mubr.f32.gmra.mrb[6].mxu0 %v61_v38  ;;  %924 = vmatprep.subr.bf16.mxu1 %v923_v21  ;;  %v375_v38 = vld [vmem:[%s1365_s3 + $0x58] sm:$0xff] }
  0x31   :  { %894 = vmatpush3.bf16.msra.mxu0 %v893_v22  ;;  %v901_v40 = vpack.c.bf16 %v375_v38, %v374_v37 }
  0x32   :  { %896 = vmatprep.subr.bf16.mxu0 %v895_v26 }
  0x33   :  { %926 = vmatpush3.bf16.msra.mxu1 %v923_v21 }
  0x34   :  { %928 = vmatprep.subr.bf16.mxu1 %v927_v29 }
  0x35   :  { %898 = vmatpush3.bf16.msra.mxu0 %v897_v31 }
  0x36   :  { %900 = vmatprep.subr.bf16.mxu0 %v899_v35 }
  0x37   :  { %930 = vmatpush3.bf16.msra.mxu1 %v927_v29 }
  0x38   :  { %932 = vmatprep.subr.bf16.mxu1 %v931_v39 }
  0x39   :  { %902 = vmatpush3.bf16.msra.mxu0 %v901_v40 }
  0x3a   :  { %904 = vmatprep.subr.bf16.mxu0 %v903_v44 }
  0x3b   :  { %934 = vmatpush3.bf16.msra.mxu1 %v931_v39 }
  0x3c   :  { %936 = vmatprep.subr.bf16.mxu1 %v935_v51 }
  0x3d   :  { %906 = vmatpush3.bf16.msra.mxu0 %v905_v52 }
  0x3e   :  { %908 = vmatprep.subr.bf16.mxu0 %v907_v56 }
  0x3f   :  { %938 = vmatpush3.bf16.msra.mxu1 %v935_v51 }
  0x40   :  { %940 = vmatprep.subr.bf16.mxu1 %v939_v63 }
  0x41   :  { %910 = vmatpush3.bf16.msra.mxu0 %v909_v0 }
  0x43   :  { %942 = vmatpush3.bf16.msra.mxu1 %v939_v63 }
  0xf7   :  { %v643_v1 = vpop.f32.mrb[0].mxu0 }
  0xf8   :  { %v644_v3 = vpop.f32.mrb[1].mxu0 }
  0xf9   :  { %v645_v5 = vadd.f32 %v644_v3, %v643_v1  ;;  %v773_v6 = vpop.f32.mrb[0].mxu1 }
  0xfa   :  { %v289_v7 = vpop.f32.mrb[1].mxu1 }
  0xfb   :  { %v646_v8 = vpop.f32.mrb[2].mxu0  ;;  %v205_v58 = vadd.f32 %v645_v5, %v601_v4  ;;  %v606_v5 = vld [vmem:[%s1367_s4] ss:$0 sm:$0xff] }
  0xfc   :  { %v647_v9 = vpop.f32.mrb[3].mxu0 }
  0xfd   :  { %v648_v10 = vadd.f32 %v647_v9, %v646_v8  ;;  %v290_v11 = vadd.f32 %v289_v7, %v205_v58  ;;  %v776_v12 = vpop.f32.mrb[2].mxu1 }
  0xfe   :  { %v299_v13 = vpop.f32.mrb[3].mxu1 }
  0xff   :  { %v210_v14 = vadd.f32 %v648_v10, %v601_v4  ;;  %v308_v2 = vmax.f32 %v290_v11, 0.0  ;;  %v649_v15 = vpop.f32.mrb[4].mxu0 }
 0x100   :  { %v650_v16 = vpop.f32.mrb[5].mxu0 }
 0x101   :  { %v295_v17 = vadd.f32 %v773_v6, %v210_v14  ;;  %v314_v18 = vrot.slane %v308_v2, 7  ;;  %v651_v19 = vadd.f32 %v650_v16, %v649_v15 }
 0x103   :  { %v309_v20 = vmax.f32 %v295_v17, 0.0  ;;  %v320_v21 = vsel %vm30_vm0, 0.0, %v314_v18  ;;  %v652_v22 = vpop.f32.mrb[6].mxu0  ;;  %v215_v23 = vadd.f32 %v651_v19, %v601_v4 }
 0x104   :  { %v653_v24 = vpop.f32.mrb[7].mxu0  ;;  %v324_v28 = vrot.slane %v320_v21, 1  ;;  %v331_v29 = vrot.slane %v320_v21, 2 }
 0x105   :  { %v315_v25 = vrot.slane %v309_v20, 7  ;;  %v654_v26 = vadd.f32 %v653_v24, %v652_v22  ;;  %v300_v27 = vadd.f32 %v299_v13, %v215_v23 }
 0x107   :  { %v321_v30 = vsel %vm30_vm0, %v315_v25, 0.0  ;;  %v316_v31 = vsel %vm30_vm0, %v314_v18, %v315_v25  ;;  %v220_v32 = vadd.f32 %v654_v26, %v601_v4  ;;  %v310_v33 = vmax.f32 %v300_v27, 0.0 }
 0x108   :  { %v334_v34 = vrot.slane %v321_v30, 2  ;;  %v325_v35 = vrot.slane %v316_v31, 1  ;;  %v332_v36 = vrot.slane %v316_v31, 2  ;;  %v327_v37 = vrot.slane %v321_v30, 1 }
 0x109   :  { %v305_v38 = vadd.f32 %v776_v12, %v220_v32  ;;  %v340_v39 = vrot.slane %v310_v33, 7 }
 0x10a   :  { %v326_v40 = vsel %vm41_vm1, %v324_v28, %v325_v35  ;;  %v333_v41 = vsel %vm49_vm2, %v331_v29, %v332_v36  ;;  %v335_v42 = vsel %vm49_vm2, %v332_v36, %v334_v34  ;;  %v328_v43 = vsel %vm41_vm1, %v325_v35, %v327_v37 }
 0x10b   :  { %v311_v44 = vmax.f32 %v305_v38, 0.0  ;;  %483 = vmatprep.mubr.f32.mxu0 %v326_v40  ;;  %809 = vmatprep.mubr.f32.mxu1 %v333_v41  ;;  %v346_v45 = vsel %vm30_vm0, 0.0, %v340_v39 }
 0x10c   :  { %608 = vmatmul.mubr.msk.f32.vlgmr.msra.gmra.mrb[8].mxu0 %vm1186_vm3, %v314_v18  ;;  %810 = vmatmul.mubr.f32.vlgmr.msra.gmra.mrb[4].mxu1 %v335_v42  ;;  %v350_v51 = vrot.slane %v346_v45, 1  ;;  %v357_v52 = vrot.slane %v346_v45, 2 }
 0x10d   :  { %v341_v49 = vrot.slane %v311_v44, 7  ;;  %488 = vmatprep.mubr.f32.mxu0 %v328_v43 }
 0x10f   :  { %v342_v50 = vsel %vm30_vm0, %v340_v39, %v341_v49  ;;  %v347_v53 = vsel %vm30_vm0, %v341_v49, 0.0 }
 0x110   :  { %489 = vmatmul.mubr.f32.gmra.mrb[10].mxu0 %v316_v31  ;;  %v351_v54 = vrot.slane %v342_v50, 1  ;;  %v358_v55 = vrot.slane %v342_v50, 2  ;;  %v360_v56 = vrot.slane %v347_v53, 2  ;;  %v353_v57 = vrot.slane %v347_v53, 1 }
 0x112   :  { %v352_v59 = vsel %vm41_vm1, %v350_v51, %v351_v54  ;;  %v359_v60 = vsel %vm49_vm2, %v357_v52, %v358_v55  ;;  %v361_v63 = vsel %vm49_vm2, %v358_v55, %v360_v56  ;;  %v354_v0 = vsel %vm41_vm1, %v351_v54, %v353_v57 }
 0x113   :  { %493 = vmatprep.mubr.f32.mxu0 %v352_v59  ;;  %812 = vmatprep.mubr.f32.mxu1 %v359_v60 }
 0x114   :  { %610 = vmatmul.mubr.msk.f32.gmra.mrb[12].mxu0 %vm1186_vm3, %v340_v39  ;;  %813 = vmatmul.mubr.f32.gmra.mrb[6].mxu1 %v361_v63 }
 0x115   :  { %498 = vmatprep.mubr.f32.mxu0 %v354_v0 }
 0x118   :  { %499 = vmatmul.mubr.f32.gmra.mrb[14].mxu0 %v342_v50 }
 0x1df   :  { %v707_v1 = vpop.f32.mrb[8].mxu0  ;;  %v811_v3 = vpop.f32.mrb[4].mxu1 }
 0x1e0   :  { %v708_v4 = vpop.f32.mrb[9].mxu0  ;;  %v570_v6 = vpop.f32.mrb[5].mxu1 }
 0x1e1   :  { %v709_v7 = vadd.f32 %v708_v4, %v707_v1 }
 0x1e3   :  { %v486_v8 = vadd.f32 %v709_v7, %v606_v5  ;;  %v710_v58 = vpop.f32.mrb[10].mxu0 }
 0x1e4   :  { %v711_v9 = vpop.f32.mrb[11].mxu0 }
 0x1e5   :  { %v571_v10 = vadd.f32 %v570_v6, %v486_v8  ;;  %v712_v11 = vadd.f32 %v711_v9, %v710_v58 }
 0x1e7   :  { %v589_v48 = vadd.f32 %v571_v10, %v1072_v46  ;;  %v491_v12 = vadd.f32 %v712_v11, %v606_v5  ;;  %v713_v13 = vpop.f32.mrb[12].mxu0  ;;  %v814_v14 = vpop.f32.mrb[6].mxu1 }
 0x1e8   :  { %v714_v2 = vpop.f32.mrb[13].mxu0  ;;  %v580_v15 = vpop.f32.mrb[7].mxu1 }
 0x1e9   :  { %593 = vst [vmem:[%s1368_s5] sm:$0xff] %v589_v48  ;;  %v576_v16 = vadd.f32 %v811_v3, %v491_v12  ;;  %v715_v17 = vadd.f32 %v714_v2, %v713_v13 }
 0x1eb   :  { %v590_v18 = vadd.f32 %v576_v16, %v1077_v47  ;;  %v496_v19 = vadd.f32 %v715_v17, %v606_v5  ;;  %v716_v20 = vpop.f32.mrb[14].mxu0 }
 0x1ec   :  { %v717_v21 = vpop.f32.mrb[15].mxu0 }
 0x1ed   :  { %594 = vst [vmem:[%s1368_s5 + $0x8] sm:$0xff] %v590_v18  ;;  %v581_v46 = vadd.f32 %v580_v15, %v496_v19  ;;  %v718_v22 = vadd.f32 %v717_v21, %v716_v20 }
 0x1ef   :  { %v591_v23 = vadd.f32 %v581_v46, %v1104_v61  ;;  %v501_v24 = vadd.f32 %v718_v22, %v606_v5 }
 0x1f1   :  { %595 = vst [vmem:[%s1368_s5 + $0x10] sm:$0xff] %v591_v23  ;;  %v586_v25 = vadd.f32 %v814_v14, %v501_v24 }
 0x1f3   :  { %v592_v26 = vadd.f32 %v586_v25, %v1109_v62 }
 0x1f5   :  { %596 = vst [vmem:[%s1368_s5 + $0x18] sm:$0xff] %v592_v26 }

</bundles_post_ra>
